<compile_context>
chip_gen: v5e
topology: v5e:2x2
jax: 0.10.0
libtpu: 0.0.40
codegen_flags: <defaults>
</compile_context>

<pallas_src>
import functools

import jax
import jax.numpy as jnp
from jax.experimental import pallas as pl
from jax.experimental.pallas import tpu as pltpu


def _contrast_kernel(tok_ref, w1_ref, b1_ref, w2_ref, b2_ref, out_ref, acc_ref,
                     *, lp_total, mask_l):
    """Pooled-sum accumulation across L tiles + fused MLP head at the last tile.

    tok_ref : [TB, TL, DP]  streamed (lane-packed) token-embedding tile
    w1_ref  : [DP, H1]      first Linear weight (tiled P times, pre-scaled 1/L)
    b1_ref  : [1, H1]
    w2_ref  : [H1, H2]
    b2_ref  : [1, H2]
    out_ref : [TB, H2]      output tile (resident across the L grid axis)
    acc_ref : [TB, DP] f32  pooled-sum accumulator scratch
    """
    l = pl.program_id(1)

    @pl.when(l == 0)
    def _():
        acc_ref[...] = jnp.zeros_like(acc_ref)

    # Accumulate the sequence-sum in f32 (input may stream as bf16; keep all
    # elementwise math in f32 — v5e has no bf16 VPU).
    tok = tok_ref[...].astype(jnp.float32)
    if mask_l:
        # Ragged last L tile: zero out-of-range rows (OOB block reads are
        # garbage, not zero) before they reach the accumulator.
        tl = tok.shape[1]
        row = jax.lax.broadcasted_iota(jnp.int32, tok.shape, 1)
        tok = jnp.where(row + l * tl < lp_total, tok, 0.0)
    acc_ref[...] += jnp.sum(tok, axis=1)

    @pl.when(l == pl.num_programs(1) - 1)
    def _():
        pooled = acc_ref[...]                # raw sum; unpack + 1/L folded into w1
        h = jnp.dot(pooled, w1_ref[...], preferred_element_type=jnp.float32)
        h = jnp.maximum(h + b1_ref[...], 0.0)
        o = jnp.dot(h, w2_ref[...], preferred_element_type=jnp.float32)
        out_ref[...] = (o + b2_ref[...]).astype(out_ref.dtype)


def _round_down8(x):
    return max(8, (x // 8) * 8)


def contrast_proj_pallas(token_embeddings, w1, b1, w2, b2):
    """mean(axis=1) -> Linear -> ReLU -> Linear as one gridded Pallas kernel."""
    B, L, D = token_embeddings.shape
    H1 = w1.shape[1]
    H2 = w2.shape[1]

    # --- lane-dense packing of a small feature dim --------------------------
    # [B, L, D] -> [B, L/P, P*D] is a free contiguous reshape; it makes every
    # streamed vreg 128-lane dense for small D (D=32 -> P=4).
    if D < 128 and 128 % D == 0 and L % (128 // D) == 0:
        pack = 128 // D
    else:
        pack = 1
    Lp, DP = L // pack, pack * D
    tok = token_embeddings.reshape(B, Lp, DP) if pack > 1 else token_embeddings

    # Fold both the lane-unpack and the 1/L mean scale into w1:
    #   sum_r tok[:, r, p*D + d] * w1[d, h] / L == mean(emb, axis=1) @ w1
    w1_eff = jnp.tile(w1.astype(jnp.float32), (pack, 1)) * (1.0 / L)   # [DP, H1]
    b1r = b1.astype(jnp.float32).reshape(1, H1)
    w2f = w2.astype(jnp.float32)
    b2r = b2.astype(jnp.float32).reshape(1, H2)

    # --- generation-aware tile sizing ----------------------------------------
    # Batch tile: fill the MXU M dim / sublanes, but never exceed B so every
    # block dim is <= its array dim (ragged trailing tiles are then legal).
    if B < 8:
        TB = B
    elif B >= 512:
        TB = 256
    else:
        TB = min(128, _round_down8(B))

    try:
        vmem_cap = int(pltpu.get_tpu_info().vmem_capacity_bytes)
    except Exception:
        vmem_cap = 64 * 1024 * 1024            # conservative: v7x per-TC VMEM
    budget = min(int(vmem_cap * 0.7), 96 * 1024 * 1024)

    itemsize = jnp.dtype(tok.dtype).itemsize
    # Resident arrays (constant index_map) counted twice for double-buffering.
    resident_bytes = 4 * (DP * H1 + H1 + H1 * H2 + H2 + TB * DP + TB * H2)
    row_bytes = TB * DP * itemsize
    per_buffer = max((budget - 2 * resident_bytes - (2 << 20)) // 2, 8 * row_bytes)
    TL = max(8, min(1024, (per_buffer // row_bytes) // 8 * 8))
    if Lp <= TL:
        TL = Lp                                # block == full dim, no raggedness
    mask_l = (Lp % TL) != 0

    grid = (pl.cdiv(B, TB), pl.cdiv(Lp, TL))
    # TODO(synk): when grid[0] == 1 on v7x (2 TensorCores) one core idles;
    # splitting the L reduction across cores with a cross-core combine is not
    # implemented here.

    needed = 2 * TL * row_bytes + 2 * resident_bytes + (2 << 20)
    vmem_limit = int(min(budget, max(needed, 16 * 1024 * 1024)))

    kernel = functools.partial(_contrast_kernel, lp_total=Lp, mask_l=mask_l)

    return pl.pallas_call(
        kernel,
        out_shape=jax.ShapeDtypeStruct((B, H2), jnp.float32),
        grid_spec=pltpu.PrefetchScalarGridSpec(
            num_scalar_prefetch=0,
            grid=grid,
            in_specs=[
                pl.BlockSpec((TB, TL, DP), lambda b, l: (b, l, 0)),   # streamed
                pl.BlockSpec((DP, H1), lambda b, l: (0, 0)),          # resident
                pl.BlockSpec((1, H1), lambda b, l: (0, 0)),           # resident
                pl.BlockSpec((H1, H2), lambda b, l: (0, 0)),          # resident
                pl.BlockSpec((1, H2), lambda b, l: (0, 0)),           # resident
            ],
            out_specs=pl.BlockSpec((TB, H2), lambda b, l: (b, 0)),
            scratch_shapes=[pltpu.VMEM((TB, DP), jnp.float32)],
        ),
        compiler_params=pltpu.CompilerParams(
            dimension_semantics=("parallel", "arbitrary"),
            vmem_limit_bytes=vmem_limit),
    )(tok, w1_eff, b1r, w2f, b2r)


class ESMModelWrapperPallas:
    """JAX/Pallas port of ESMModelWrapper's forward semantics."""

    def __init__(self, vocab_size=33, embed_dim=32, key=jax.random.PRNGKey(0)):
        k0, k1, k2, k3, k4 = jax.random.split(key, 5)
        self.embed_dim = embed_dim
        # Frozen "ESM" representation stand-in: token embedding table.
        self.tok_table = jax.random.normal(k0, (vocab_size, embed_dim),
                                           dtype=jnp.float32) * 0.02
        # contrast_proj = Linear(embed_dim, 256) -> ReLU -> Linear(256, 128)
        lim1 = 1.0 / (embed_dim ** 0.5)
        self.w1 = jax.random.uniform(k1, (embed_dim, 256), jnp.float32, -lim1, lim1)
        self.b1 = jax.random.uniform(k2, (256,), jnp.float32, -lim1, lim1)
        lim2 = 1.0 / (256 ** 0.5)
        self.w2 = jax.random.uniform(k3, (256, 128), jnp.float32, -lim2, lim2)
        self.b2 = jax.random.uniform(k4, (128,), jnp.float32, -lim2, lim2)

    def __call__(self, sequences):
        # sequences: int32 [B, L] token ids.
        # TODO(synk): frozen pretrained ESM-2 backbone replaced by a frozen
        # token-embedding lookup producing the same [B, L, D] interface.  The
        # [B, L, D] tensor is materialized because the module returns it.
        token_embeddings = jnp.take(self.tok_table, sequences, axis=0)   # [B, L, D]
        contrast_emb = contrast_proj_pallas(
            token_embeddings, self.w1, self.b1, self.w2, self.b2)        # [B, 128]
        return token_embeddings, contrast_emb


def _reference_head(tok_emb, w1, b1, w2, b2):
    pooled = tok_emb.astype(jnp.float32).mean(axis=1)
    h = jnp.maximum(
        jnp.dot(pooled, w1, precision=jax.lax.Precision.HIGHEST) + b1, 0.0)
    return jnp.dot(h, w2, precision=jax.lax.Precision.HIGHEST) + b2


if __name__ == "__main__":
    key = jax.random.PRNGKey(0)
    k_model, k_seq, k_seq2 = jax.random.split(key, 3)

    B, L, D, V = 2, 8, 32, 33
    model = ESMModelWrapperPallas(vocab_size=V, embed_dim=D, key=k_model)

    sequences = jax.random.randint(k_seq, (B, L), 0, V, dtype=jnp.int32)
    tok_emb, contrast_emb = model(sequences)
    jax.block_until_ready((tok_emb, contrast_emb))

    ref = _reference_head(tok_emb, model.w1, model.b1, model.w2, model.b2)
    assert tok_emb.shape == (B, L, D)
    assert contrast_emb.shape == (B, 128)
    assert jnp.allclose(contrast_emb, ref, atol=5e-3, rtol=5e-3)

    # bf16 streaming path (halves HBM/DMA bytes; f32 accumulation in-kernel).
    contrast_bf16 = contrast_proj_pallas(
        tok_emb.astype(jnp.bfloat16), model.w1, model.b1, model.w2, model.b2)
    jax.block_until_ready(contrast_bf16)
    assert jnp.allclose(contrast_bf16, ref, atol=3e-2, rtol=3e-2)

    # Larger ragged shapes: exercises the multi-step L grid, the in-kernel
    # ragged-L mask (1025 packed rows vs TL=1024) and the ragged batch tile.
    B2, L2 = 3, 4100
    seq2 = jax.random.randint(k_seq2, (B2, L2), 0, V, dtype=jnp.int32)
    tok_emb2, contrast_emb2 = model(seq2)
    jax.block_until_ready(contrast_emb2)
    ref2 = _reference_head(tok_emb2, model.w1, model.b1, model.w2, model.b2)
    assert contrast_emb2.shape == (B2, 128)
    assert jnp.allclose(contrast_emb2, ref2, atol=5e-3, rtol=5e-3)

    print("KERNEL_OK")
</pallas_src>

<mosaic_0001>
module attributes {stable_mosaic.version = 11 : i64} {
  func.func @_contrast_kernel(%arg0: i32, %arg1: i32, %arg2: memref<2x2x128xf32, #tpu.memory_space<vmem>>, %arg3: memref<128x256xf32, #tpu.memory_space<vmem>>, %arg4: memref<1x256xf32, #tpu.memory_space<vmem>>, %arg5: memref<256x128xf32, #tpu.memory_space<vmem>>, %arg6: memref<1x128xf32, #tpu.memory_space<vmem>>, %arg7: memref<2x128xf32, #tpu.memory_space<vmem>>, %arg8: memref<2x128xf32, #tpu.memory_space<vmem>>) attributes {dimension_semantics = [#tpu.dimension_semantics<parallel>, #tpu.dimension_semantics<arbitrary>], iteration_bounds = array<i64: 1, 1>, scalar_prefetch = 0 : i64, scratch_operands = 1 : i64, tpu.core_type = #tpu.core_type<tc>, window_params = [{transform_indices = @transform_0, window_bounds = array<i64: 2, 2, 128>}, {pipeline_mode = #tpu.pipeline_mode<synchronous>, transform_indices = @transform_1, window_bounds = array<i64: 128, 256>}, {pipeline_mode = #tpu.pipeline_mode<synchronous>, transform_indices = @transform_2, window_bounds = array<i64: 1, 256>}, {pipeline_mode = #tpu.pipeline_mode<synchronous>, transform_indices = @transform_3, window_bounds = array<i64: 256, 128>}, {pipeline_mode = #tpu.pipeline_mode<synchronous>, transform_indices = @transform_4, window_bounds = array<i64: 1, 128>}, {transform_indices = @transform_5, window_bounds = array<i64: 2, 128>}]} {
    %c0_i32 = arith.constant 0 : i32
    %0 = arith.cmpi eq, %arg1, %c0_i32 : i32
    %1 = arith.extui %0 : i1 to i32
    %c0_i32_0 = arith.constant 0 : i32
    %2 = arith.cmpi ne, %1, %c0_i32_0 : i32
    scf.if %2 {
      %cst_9 = arith.constant 0.000000e+00 : f32
      %11 = vector.broadcast %cst_9 : f32 to vector<2x128xf32>
      %c0_10 = arith.constant 0 : index
      %c0_11 = arith.constant 0 : index
      %12 = vector.load %arg8[%c0_10, %c0_11] : memref<2x128xf32, #tpu.memory_space<vmem>>, vector<2x128xf32>
      tpu.vector_store %arg8[%c0_10, %c0_11], %11 {strides = array<i32>} : memref<2x128xf32, #tpu.memory_space<vmem>>, vector<2x128xf32>,
    } else {
    }
    %c0 = arith.constant 0 : index
    %c0_1 = arith.constant 0 : index
    %c0_2 = arith.constant 0 : index
    %3 = vector.load %arg2[%c0, %c0_1, %c0_2] : memref<2x2x128xf32, #tpu.memory_space<vmem>>, vector<2x2x128xf32>
    %c0_3 = arith.constant 0 : index
    %c0_4 = arith.constant 0 : index
    %4 = vector.load %arg8[%c0_3, %c0_4] : memref<2x128xf32, #tpu.memory_space<vmem>>, vector<2x128xf32>
    %cst = arith.constant dense<0.000000e+00> : vector<2x128xf32>
    %5 = vector.multi_reduction <add>, %3, %cst [1] : vector<2x2x128xf32> to vector<2x128xf32>
    %6 = arith.addf %4, %5 : vector<2x128xf32>
    %c0_5 = arith.constant 0 : index
    %c0_6 = arith.constant 0 : index
    %7 = vector.load %arg8[%c0_5, %c0_6] : memref<2x128xf32, #tpu.memory_space<vmem>>, vector<2x128xf32>
    tpu.vector_store %arg8[%c0_5, %c0_6], %6 {strides = array<i32>} : memref<2x128xf32, #tpu.memory_space<vmem>>, vector<2x128xf32>,
    %c0_i32_7 = arith.constant 0 : i32
    %8 = arith.cmpi eq, %arg1, %c0_i32_7 : i32
    %9 = arith.extui %8 : i1 to i32
    %c0_i32_8 = arith.constant 0 : i32
    %10 = arith.cmpi ne, %9, %c0_i32_8 : i32
    scf.if %10 {
      %c0_9 = arith.constant 0 : index
      %c0_10 = arith.constant 0 : index
      %11 = vector.load %arg8[%c0_9, %c0_10] : memref<2x128xf32, #tpu.memory_space<vmem>>, vector<2x128xf32>
      %c0_11 = arith.constant 0 : index
      %c0_12 = arith.constant 0 : index
      %12 = vector.load %arg3[%c0_11, %c0_12] : memref<128x256xf32, #tpu.memory_space<vmem>>, vector<128x256xf32>
      %cst_13 = arith.constant dense<0.000000e+00> : vector<2x256xf32>
      %13 = tpu.matmul %11, %12, %cst_13 {dimension_numbers = #tpu.dot_dimension_numbers<[1], [0], [0], [1], [0, 0, 1, 1], [], []>} : vector<2x128xf32>, vector<128x256xf32>, vector<2x256xf32> -> vector<2x256xf32>
      %c0_14 = arith.constant 0 : index
      %c0_15 = arith.constant 0 : index
      %14 = vector.load %arg4[%c0_14, %c0_15] : memref<1x256xf32, #tpu.memory_space<vmem>>, vector<1x256xf32>
      %15 = vector.broadcast %14 : vector<1x256xf32> to vector<2x256xf32>
      %16 = arith.addf %13, %15 : vector<2x256xf32>
      %cst_16 = arith.constant 0.000000e+00 : f32
      %17 = vector.broadcast %cst_16 : f32 to vector<2x256xf32>
      %18 = arith.maximumf %16, %17 : vector<2x256xf32>
      %c0_17 = arith.constant 0 : index
      %c0_18 = arith.constant 0 : index
      %19 = vector.load %arg5[%c0_17, %c0_18] : memref<256x128xf32, #tpu.memory_space<vmem>>, vector<256x128xf32>
      %cst_19 = arith.constant dense<0.000000e+00> : vector<2x128xf32>
      %20 = tpu.matmul %18, %19, %cst_19 {dimension_numbers = #tpu.dot_dimension_numbers<[1], [0], [0], [1], [0, 0, 1, 1], [], []>} : vector<2x256xf32>, vector<256x128xf32>, vector<2x128xf32> -> vector<2x128xf32>
      %c0_20 = arith.constant 0 : index
      %c0_21 = arith.constant 0 : index
      %21 = vector.load %arg6[%c0_20, %c0_21] : memref<1x128xf32, #tpu.memory_space<vmem>>, vector<1x128xf32>
      %22 = vector.broadcast %21 : vector<1x128xf32> to vector<2x128xf32>
      %23 = arith.addf %20, %22 : vector<2x128xf32>
      %c0_22 = arith.constant 0 : index
      %c0_23 = arith.constant 0 : index
      %24 = vector.load %arg7[%c0_22, %c0_23] : memref<2x128xf32, #tpu.memory_space<vmem>>, vector<2x128xf32>
      tpu.vector_store %arg7[%c0_22, %c0_23], %23 {strides = array<i32>} : memref<2x128xf32, #tpu.memory_space<vmem>>, vector<2x128xf32>,
    } else {
    }
    return
  }
  func.func @transform_0(%arg0: i32, %arg1: i32) -> (i32, i32, i32) {
    %c0_i32 = arith.constant 0 : i32
    %c0_i32_0 = arith.constant 0 : i32
    return %arg0, %arg1, %c0_i32 : i32, i32, i32
  }
  func.func @transform_1(%arg0: i32, %arg1: i32) -> (i32, i32) {
    %c0_i32 = arith.constant 0 : i32
    %c0_i32_0 = arith.constant 0 : i32
    %c0_i32_1 = arith.constant 0 : i32
    return %c0_i32, %c0_i32_0 : i32, i32
  }
  func.func @transform_2(%arg0: i32, %arg1: i32) -> (i32, i32) {
    %c0_i32 = arith.constant 0 : i32
    %c0_i32_0 = arith.constant 0 : i32
    %c0_i32_1 = arith.constant 0 : i32
    return %c0_i32, %c0_i32_0 : i32, i32
  }
  func.func @transform_3(%arg0: i32, %arg1: i32) -> (i32, i32) {
    %c0_i32 = arith.constant 0 : i32
    %c0_i32_0 = arith.constant 0 : i32
    %c0_i32_1 = arith.constant 0 : i32
    return %c0_i32, %c0_i32_0 : i32, i32
  }
  func.func @transform_4(%arg0: i32, %arg1: i32) -> (i32, i32) {
    %c0_i32 = arith.constant 0 : i32
    %c0_i32_0 = arith.constant 0 : i32
    %c0_i32_1 = arith.constant 0 : i32
    return %c0_i32, %c0_i32_0 : i32, i32
  }
  func.func @transform_5(%arg0: i32, %arg1: i32) -> (i32, i32) {
    %c0_i32 = arith.constant 0 : i32
    %c0_i32_0 = arith.constant 0 : i32
    return %arg0, %c0_i32 : i32, i32
  }
}

</mosaic_0001>

<bundles_post_ra>
// kernel: tpu_custom_call.1
= control target key start
LH: loop header
LB: loop body
LE: loop exit
PB: predicated region body
PF: predicated region fallthrough
CT: control target
= control target key end

     0   :  { %10 = vsyncpa [#allocation4], 0  ;;  %s494_s0 = inlined_call_operand.hbm [shape: f32[2,2,128], index: 0, kind: input, shape index: {}]   ;;  %s495_s1 = inlined_call_operand.hbm [shape: f32[128,256], index: 1, kind: input, shape index: {}]   ;;  %s496_s2 = inlined_call_operand.hbm [shape: f32[1,256], index: 2, kind: input, shape index: {}]   ;;  %s497_s3 = inlined_call_operand.hbm [shape: f32[256,128], index: 3, kind: input, shape index: {}]   ;;  %s498_s4 = inlined_call_operand.vmem [shape: f32[1,128], index: 4, kind: input, shape index: {}]   ;;  %s499_s5 = inlined_call_operand.hbm [shape: f32[2,128], index: 5, kind: output, shape index: {}]  }
   0x1   :  { %11 = vsyncpa [#allocation7], 0 }
   0x2   :  { %12 = vsyncpa [#allocation10], 0  ;;  %s31_s20 = sshll.u32 %s495_s1, 4  ;;  %s32_s20 = int_to_ptr.hbm [resolvable:$true] %s31_s20 }
   0x3   :  { %13 = vsyncpa [#allocation5], 0  ;;  %s433_s21 = smov [#allocation6]   ;;  %s18_s25 = sshll.u32 %s494_s0, 4  ;;  %s19_s25 = int_to_ptr.hbm [resolvable:$true] %s18_s25 }
   0x4   :  { %s33_s22 = sshll.u32 %s433_s21, 4  ;;  %s434_s26 = smov 256   ;;  %s34_s22 = int_to_ptr.vmem [resolvable:$true] %s33_s22 }
   0x5   :  { %s435_s27 = smov 16   ;;  %s436_s28 = smov [#allocation3]  }
   0x6   :  { %39 = dma.hbm_to_vmem [thread:$0]  %s32_s20, 4096, %s34_s22, [#allocation7], %s434_s26, %s434_s26, %s435_s27  }
   0x7   :  { %s20_s29 = sshll.u32 %s436_s28, 4  ;;  %s437_s30 = smov 32   ;;  %s21_s29 = int_to_ptr.vmem [resolvable:$true] %s20_s29 }
   0x8   :  { %s438_s6 = smov 2   ;;  %s45_s8 = sshll.u32 %s496_s2, 4  ;;  %s46_s8 = int_to_ptr.hbm [resolvable:$true] %s45_s8 }
   0x9   :  { %26 = dma.hbm_to_vmem [thread:$0]  %s19_s25, 64, %s21_s29, [#allocation4], %s437_s30, %s437_s30, %s438_s6  }
   0xa   :  { %s439_s9 = smov [#allocation8]   ;;  %s55_s12 = sshll.u32 %s497_s3, 4  ;;  %s56_s12 = int_to_ptr.hbm [resolvable:$true] %s55_s12 }
   0xb   :  { %s47_s10 = sshll.u32 %s439_s9, 4  ;;  %s440_s13 = smov [#allocation9]   ;;  %s48_s10 = int_to_ptr.vmem [resolvable:$true] %s47_s10 }
   0xc   :  { %50 = dma.hbm_to_vmem [thread:$0]  %s46_s8, 32, %s48_s10, [#allocation7]  }
   0xd   :  { %s57_s14 = sshll.u32 %s440_s13, 4  ;;  %s441_s15 = smov 128   ;;  %s58_s14 = int_to_ptr.vmem [resolvable:$true] %s57_s14 }
   0xe   :  { %s442_s16 = smov 8  }
   0xf   :  { %63 = dma.hbm_to_vmem [thread:$0]  %s56_s12, 4096, %s58_s14, [#allocation10], %s441_s15, %s441_s15, %s442_s16  }
  0x10   :  { %425 = dma.done.wait [#allocation4], 64  }
  0x11   :  { %426 = vsyncadd [#allocation4], 4294967232 }
  0x12   :  { %427 = dma.done.wait [#allocation7], 4128  }
  0x13   :  { %428 = vsyncadd [#allocation7], 4294963168 }
  0x14   :  { %429 = dma.done.wait [#allocation10], 4096  }
  0x15   :  { %430 = vsyncadd [#allocation10], 4294963200  ;;  %v443_v0 = vmov 0.0   ;;  %v146_v1 = vld [vmem:[#allocation6 + $0xf0] sm:$0xff]  ;;  %v144_v2 = vld [vmem:[#allocation6 + $0xe0] sm:$0xff]  ;;  %vm90_vm0 = vcmask 1041408  }
  0x16   :  { %86 = vst [vmem:[#allocation2] sm:$0x3] %v443_v0  ;;  %v147_v3 = vld [vmem:[#allocation6 + $0xf8] sm:$0xff]  ;;  %154 = vmatpush.msra.mxu0 %v146_v1  ;;  %v145_v4 = vld [vmem:[#allocation6 + $0xe8] sm:$0xff]  ;;  %v142_v5 = vld [vmem:[#allocation6 + $0xd0] sm:$0xff]  ;;  %vm107_vm1 = vcmask 1041409  }
  0x17   :  { %174 = vmatpush.msra.mxu1 %v147_v3  ;;  %v143_v6 = vld [vmem:[#allocation6 + $0xd8] sm:$0xff]  ;;  %v140_v7 = vld [vmem:[#allocation6 + $0xc0] sm:$0xff]  ;;  %v141_v8 = vld [vmem:[#allocation6 + $0xc8] sm:$0xff]  ;;  %s444_s17 = smov [#allocation11]   ;;  %s280_s21 = sshll.u32 %s499_s5, 4  ;;  %s281_s21 = int_to_ptr.hbm [resolvable:$true] %s280_s21 }
  0x18   :  { %155 = vmatpush.msra.mxu0 %v144_v2  ;;  %v138_v9 = vld [vmem:[#allocation6 + $0xb0] sm:$0xff]  ;;  %v139_v10 = vld [vmem:[#allocation6 + $0xb8] sm:$0xff]  ;;  %v136_v11 = vld [vmem:[#allocation6 + $0xa0] sm:$0xff]  ;;  %s278_s18 = sshll.u32 %s444_s17, 4  ;;  %s279_s18 = int_to_ptr.vmem [resolvable:$true] %s278_s18 }
  0x19   :  { %175 = vmatpush.msra.mxu1 %v145_v4  ;;  %v137_v12 = vld [vmem:[#allocation6 + $0xa8] sm:$0xff]  ;;  %v134_v13 = vld [vmem:[#allocation6 + $0x90] sm:$0xff]  ;;  %v135_v14 = vld [vmem:[#allocation6 + $0x98] sm:$0xff] }
  0x1a   :  { %156 = vmatpush.msra.mxu0 %v142_v5  ;;  %v87_v15 = vld [vmem:[#allocation3] sm:$0x3]  ;;  %v88_v16 = vld [vmem:[#allocation3 + $0x2] sm:$0x3]  ;;  %v132_v17 = vld [vmem:[#allocation6 + $0x80] sm:$0xff] }
  0x1b   :  { %176 = vmatpush.msra.mxu1 %v143_v6  ;;  %v91_v18 = vsel %vm90_vm0, %v87_v15, 0.0  ;;  %v98_v19 = vsel %vm90_vm0, %v88_v16, 0.0  ;;  %v211_v20 = vld [vmem:[#allocation9 + $0x78] sm:$0xff]  ;;  %v133_v21 = vld [vmem:[#allocation6 + $0x88] sm:$0xff]  ;;  %v210_v24 = vld [vmem:[#allocation9 + $0x70] sm:$0xff] }
  0x1c   :  { %157 = vmatpush.msra.mxu0 %v140_v7  ;;  %v92_v22 = vrot.slane %v91_v18, 4  ;;  %v99_v23 = vrot.slane %v98_v19, 4  ;;  %232 = vmatpush.msra.mxu2 %v211_v20  ;;  %v227_v25 = vld [vmem:[#allocation9 + $0xf8] sm:$0xff]  ;;  %v209_v26 = vld [vmem:[#allocation9 + $0x68] sm:$0xff]  ;;  %v226_v27 = vld [vmem:[#allocation9 + $0xf0] sm:$0xff] }
  0x1d   :  { %177 = vmatpush.msra.mxu1 %v141_v8  ;;  %v130_v28 = vld [vmem:[#allocation6 + $0x70] sm:$0xff]  ;;  %v131_v29 = vld [vmem:[#allocation6 + $0x78] sm:$0xff]  ;;  %252 = vmatpush.msra.mxu3 %v227_v25  ;;  %v208_v32 = vld [vmem:[#allocation9 + $0x60] sm:$0xff] }
  0x1e   :  { %158 = vmatpush.msra.mxu0 %v138_v9  ;;  %v93_v30 = vadd.f32 %v92_v22, %v91_v18  ;;  %v100_v31 = vadd.f32 %v99_v23, %v98_v19  ;;  %233 = vmatpush.msra.mxu2 %v210_v24  ;;  %v225_v33 = vld [vmem:[#allocation9 + $0xe8] sm:$0xff]  ;;  %v128_v34 = vld [vmem:[#allocation6 + $0x60] sm:$0xff]  ;;  %v127_v41 = vld [vmem:[#allocation6 + $0x58] sm:$0xff] }
  0x1f   :  { %178 = vmatpush.msra.mxu1 %v139_v10  ;;  %v129_v35 = vld [vmem:[#allocation6 + $0x68] sm:$0xff]  ;;  %253 = vmatpush.msra.mxu3 %v226_v27  ;;  %v207_v38 = vld [vmem:[#allocation9 + $0x58] sm:$0xff]  ;;  %v126_v40 = vld [vmem:[#allocation6 + $0x50] sm:$0xff] }
  0x20   :  { %159 = vmatpush.msra.mxu0 %v136_v11  ;;  %v94_v36 = vrot.slane %v93_v30, 2  ;;  %v101_v37 = vrot.slane %v100_v31, 2  ;;  %234 = vmatpush.msra.mxu2 %v209_v26  ;;  %v224_v39 = vld [vmem:[#allocation9 + $0xe0] sm:$0xff]  ;;  %v206_v44 = vld [vmem:[#allocation9 + $0x50] sm:$0xff]  ;;  %v223_v45 = vld [vmem:[#allocation9 + $0xd8] sm:$0xff] }
  0x21   :  { %179 = vmatpush.msra.mxu1 %v137_v12  ;;  %254 = vmatpush.msra.mxu3 %v225_v33  ;;  %v124_v46 = vld [vmem:[#allocation6 + $0x40] sm:$0xff]  ;;  %v125_v47 = vld [vmem:[#allocation6 + $0x48] sm:$0xff]  ;;  %v222_v51 = vld [vmem:[#allocation9 + $0xd0] sm:$0xff] }
  0x22   :  { %160 = vmatpush.msra.mxu0 %v134_v13  ;;  %v95_v42 = vadd.f32 %v94_v36, %v93_v30  ;;  %v102_v43 = vadd.f32 %v101_v37, %v100_v31  ;;  %235 = vmatpush.msra.mxu2 %v208_v32  ;;  %v205_v50 = vld [vmem:[#allocation9 + $0x48] sm:$0xff]  ;;  %v123_v53 = vld [vmem:[#allocation6 + $0x38] sm:$0xff]  ;;  %v204_v57 = vld [vmem:[#allocation9 + $0x40] sm:$0xff] }
  0x23   :  { %180 = vmatpush.msra.mxu1 %v135_v14  ;;  %255 = vmatpush.msra.mxu3 %v224_v39  ;;  %v122_v52 = vld [vmem:[#allocation6 + $0x30] sm:$0xff]  ;;  %v89_v54 = vld [vmem:[#allocation2] sm:$0x3]  ;;  %v120_v59 = vld [vmem:[#allocation6 + $0x20] sm:$0xff] }
  0x24   :  { %161 = vmatpush.msra.mxu0 %v132_v17  ;;  %v96_v48 = vrot.slane %v95_v42, 1  ;;  %v103_v49 = vrot.slane %v102_v43, 1  ;;  %236 = vmatpush.msra.mxu2 %v207_v38  ;;  %v221_v58 = vld [vmem:[#allocation9 + $0xc8] sm:$0xff]  ;;  %v203_v63 = vld [vmem:[#allocation9 + $0x38] sm:$0xff]  ;;  %v220_v0 = vld [vmem:[#allocation9 + $0xc0] sm:$0xff] }
  0x25   :  { %181 = vmatpush.msra.mxu1 %v133_v21  ;;  %256 = vmatpush.msra.mxu3 %v223_v45  ;;  %v121_v60 = vld [vmem:[#allocation6 + $0x28] sm:$0xff]  ;;  %v118_v1 = vld [vmem:[#allocation6 + $0x10] sm:$0xff]  ;;  %v119_v2 = vld [vmem:[#allocation6 + $0x18] sm:$0xff] }
  0x26   :  { %162 = vmatpush.msra.mxu0 %v130_v28  ;;  %v97_v55 = vadd.f32 %v96_v48, %v95_v42  ;;  %v104_v56 = vadd.f32 %v103_v49, %v102_v43  ;;  %237 = vmatpush.msra.mxu2 %v206_v44  ;;  %v202_v3 = vld [vmem:[#allocation9 + $0x30] sm:$0xff]  ;;  %v219_v4 = vld [vmem:[#allocation9 + $0xb8] sm:$0xff]  ;;  %v117_v6 = vld [vmem:[#allocation6 + $0x8] sm:$0xff] }
  0x27   :  { %182 = vmatpush.msra.mxu1 %v131_v29  ;;  %257 = vmatpush.msra.mxu3 %v222_v51  ;;  %v116_v5 = vld [vmem:[#allocation6] sm:$0xff]  ;;  %v201_v7 = vld [vmem:[#allocation9 + $0x28] sm:$0xff]  ;;  %v218_v8 = vld [vmem:[#allocation9 + $0xb0] sm:$0xff] }
  0x28   :  { %163 = vmatpush.msra.mxu0 %v128_v34  ;;  %v108_v61 = vsel %vm107_vm1, %v104_v56, %v97_v55  ;;  %238 = vmatpush.msra.mxu2 %v205_v50  ;;  %v200_v9 = vld [vmem:[#allocation9 + $0x20] sm:$0xff]  ;;  %v217_v10 = vld [vmem:[#allocation9 + $0xa8] sm:$0xff]  ;;  %v199_v11 = vld [vmem:[#allocation9 + $0x18] sm:$0xff] }
  0x29   :  { %183 = vmatpush.msra.mxu1 %v129_v35  ;;  %v110_v62 = vadd.f32 %v108_v61, %v89_v54  ;;  %258 = vmatpush.msra.mxu3 %v221_v58  ;;  %v216_v12 = vld [vmem:[#allocation9 + $0xa0] sm:$0xff]  ;;  %v198_v14 = vld [vmem:[#allocation9 + $0x10] sm:$0xff]  ;;  %v215_v15 = vld [vmem:[#allocation9 + $0x98] sm:$0xff] }
  0x2a   :  { %164 = vmatpush.msra.mxu0 %v126_v40  ;;  %239 = vmatpush.msra.mxu2 %v204_v57  ;;  %v197_v16 = vld [vmem:[#allocation9 + $0x8] sm:$0xff]  ;;  %v214_v17 = vld [vmem:[#allocation9 + $0x90] sm:$0xff]  ;;  %v196_v18 = vld [vmem:[#allocation9] sm:$0xff] }
  0x2b   :  { %184 = vmatpush.msra.mxu1 %v127_v41  ;;  %111 = vst [vmem:[#allocation2] sm:$0x3] %v110_v62  ;;  %259 = vmatpush.msra.mxu3 %v220_v0  ;;  %v213_v19 = vld [vmem:[#allocation9 + $0x88] sm:$0xff]  ;;  %v212_v20 = vld [vmem:[#allocation9 + $0x80] sm:$0xff]  ;;  %v148_v21 = vld [vmem:[#allocation8] sm:$0x3] }
  0x2c   :  { %165 = vmatpush.msra.mxu0 %v124_v46  ;;  %240 = vmatpush.msra.mxu2 %v203_v63  ;;  %v150_v22 = vperm.slane %v148_v21, 0  ;;  %v151_v23 = vperm.slane %v148_v21, 1  ;;  %v304_v30 = vld [vmem:[%s498_s4] ss:$0 sm:$0xff] }
  0x2d   :  { %185 = vmatpush.msra.mxu1 %v125_v47  ;;  %260 = vmatpush.msra.mxu3 %v219_v4 }
  0x2e   :  { %166 = vmatpush.msra.mxu0 %v122_v52  ;;  %241 = vmatpush.msra.mxu2 %v202_v3 }
  0x2f   :  { %186 = vmatpush.msra.mxu1 %v123_v53  ;;  %261 = vmatpush.msra.mxu3 %v218_v8 }
  0x30   :  { %167 = vmatpush.msra.mxu0 %v120_v59  ;;  %242 = vmatpush.msra.mxu2 %v201_v7 }
  0x31   :  { %187 = vmatpush.msra.mxu1 %v121_v60  ;;  %262 = vmatpush.msra.mxu3 %v217_v10 }
  0x32   :  { %168 = vmatpush.msra.mxu0 %v118_v1  ;;  %v115_v13 = vld [vmem:[#allocation2] sm:$0x3]  ;;  %243 = vmatpush.msra.mxu2 %v200_v9 }
  0x33   :  { %188 = vmatpush.msra.mxu1 %v119_v2  ;;  %263 = vmatpush.msra.mxu3 %v216_v12 }
  0x34   :  { %169 = vmatpush.msra.mxu0 %v116_v5  ;;  %244 = vmatpush.msra.mxu2 %v199_v11 }
  0x35   :  { %189 = vmatpush.msra.mxu1 %v117_v6  ;;  %170 = vmatmul.f32.vlgmr.msra.gmra.mxu0 %v115_v13 }
  0x36   :  { %190 = vmatmul.f32.vlgmr.msra.gmra.mxu1 %v115_v13  ;;  %245 = vmatpush.msra.mxu2 %v198_v14 }
  0x37   :  { %264 = vmatpush.msra.mxu3 %v215_v15 }
  0x38   :  { %246 = vmatpush.msra.mxu2 %v197_v16 }
  0x39   :  { %265 = vmatpush.msra.mxu3 %v214_v17 }
  0x3a   :  { %247 = vmatpush.msra.mxu2 %v196_v18 }
  0x3b   :  { %266 = vmatpush.msra.mxu3 %v213_v19 }
  0x3d   :  { %267 = vmatpush.msra.mxu3 %v212_v20 }
  0xb2   :  { %v171_v24 = vpop.f32.mrf.mxu0 }
  0xb3   :  { %v191_v25 = vpop.f32.mrf.mxu1  ;;  %v172_v26 = vadd.f32 %v171_v24, %v150_v22 }
  0xb4   :  { %v192_v27 = vadd.f32 %v191_v25, %v151_v23 }
  0xb5   :  { %v194_v28 = vmax.f32 %v172_v26, 0.0 }
  0xb6   :  { %v195_v29 = vmax.f32 %v192_v27, 0.0 }
  0xb7   :  { %248 = vmatmul.f32.vlgmr.msra.gmra.mxu2 %v194_v28 }
  0xb8   :  { %268 = vmatmul.f32.vlgmr.msra.gmra.mxu3 %v195_v29 }
 0x13a   :  { %v249_v31 = vpop.f32.mrf.mxu2 }
 0x13b   :  { %v269_v32 = vpop.f32.mrf.mxu3  ;;  %v250_v33 = vadd.f32 %v304_v30, %v249_v31 }
 0x13d   :  { %v270_v34 = vadd.f32 %v269_v32, %v250_v33 }
 0x13f   :  { %272 = vst [vmem:[#allocation11] sm:$0x3] %v270_v34 }
 0x140   :  { %283 = dma.vmem_to_hbm [thread:$0]  %s279_s18, 32, %s281_s21, [#allocation5]  }
 0x141   :  { %431 = dma.done.wait [#allocation5], 32  }
 0x142   :  { %432 = vsyncadd [#allocation5], 4294967264 }
 0x143   :  { %288 = vsyncpa [#allocation4], 1 }
 0x144   :  { %289 = vsyncpa [#allocation7], 1 }
 0x145   :  { %290 = vsyncpa [#allocation10], 1 }
 0x146   :  { %291 = vsyncpa [#allocation5], 1 }

</bundles_post_ra>
